<compile_context>
chip_gen: v5e
topology: v5e:2x2
jax: 0.10.0
libtpu: 0.0.40
codegen_flags: <defaults>
</compile_context>

<pallas_src>
import functools
import math

import jax
import jax.numpy as jnp
from jax.experimental import pallas as pl
from jax.experimental.pallas import tpu as pltpu

VMEM = pl.BlockSpec(memory_space=pltpu.MemorySpace.VMEM)
SMEM = pl.BlockSpec(memory_space=pltpu.MemorySpace.SMEM)

VMEM_LIMIT = 48 * 1024 * 1024          # <= v7x 64 MiB physical; fine on v5e/v6e
FEATS_RESIDENT_BYTES = 16 * 1024 * 1024  # budget for the (double-buffered) resident feats


def _round_up(x, m):
    return ((x + m - 1) // m) * m


def _pad2(a, rows, cols):
    r, c = a.shape
    return jnp.pad(a, ((0, rows - r), (0, cols - c)))


def _pad1(a, n):
    return jnp.pad(a, (0, n - a.shape[0]))


def _pick_tile(n_pad, candidates):
    """Largest candidate that divides n_pad with >=2 grid iterations (v7x: 2 TCs)."""
    for t in candidates:
        if n_pad % t == 0 and n_pad // t >= 2:
            return t
    return n_pad


# -----------------------------------------------------------------------------
# Kernel 1a: feats = X @ W   (row-tiled, bf16 in / bf16 out, f32 MXU acc)
# -----------------------------------------------------------------------------
def _feats_kernel(x_ref, w_ref, o_ref):
    o_ref[...] = jnp.dot(x_ref[...], w_ref[...],
                         preferred_element_type=jnp.float32).astype(o_ref.dtype)


def wgcn_feats(x_bf16, w_bf16, *, row_tile):
    n_pad, dpad = x_bf16.shape
    return pl.pallas_call(
        _feats_kernel,
        out_shape=jax.ShapeDtypeStruct((n_pad, dpad), jnp.bfloat16),
        grid_spec=pltpu.PrefetchScalarGridSpec(
            num_scalar_prefetch=0,
            grid=(n_pad // row_tile,),
            in_specs=[pl.BlockSpec((row_tile, dpad), lambda i: (i, 0)),
                      pl.BlockSpec((dpad, dpad), lambda i: (0, 0))],
            out_specs=pl.BlockSpec((row_tile, dpad), lambda i: (i, 0))),
        compiler_params=pltpu.CompilerParams(
            dimension_semantics=("parallel",),
            vmem_limit_bytes=VMEM_LIMIT),
    )(x_bf16, w_bf16)


# -----------------------------------------------------------------------------
# Kernel 1b: out = tanh(BN(Adj @ feats + bias))   (bias folded into BN shift)
#   - adj streamed in (row_tile, k_tile) bf16 tiles
#   - feats VMEM-resident (constant index map), sliced in-kernel per k tile
#   - f32 accumulator, bf16 output
# -----------------------------------------------------------------------------
def _aggregate_kernel(adj_ref, feats_ref, sc_ref, sh_ref, o_ref, acc_ref, *,
                      k_tile, feats_resident, apply_tanh):
    k = pl.program_id(1)

    @pl.when(k == 0)
    def _():
        acc_ref[...] = jnp.zeros_like(acc_ref)

    if feats_resident:
        start = pl.multiple_of(k * k_tile, k_tile)
        f = feats_ref[pl.ds(start, k_tile), :]
    else:
        f = feats_ref[...]
    acc_ref[...] += jnp.dot(adj_ref[...], f, preferred_element_type=jnp.float32)

    @pl.when(k == pl.num_programs(1) - 1)
    def _():
        # scale/shift already carry BatchNorm1d(eval) and the GC bias fold;
        # pad feature columns have scale==shift==0 so they stay exactly zero.
        out = acc_ref[...] * sc_ref[...] + sh_ref[...]
        if apply_tanh:
            out = jnp.tanh(out)
        # F.dropout(..., training=False) is identity
        o_ref[...] = out.astype(o_ref.dtype)


def wgcn_aggregate(adj_bf16, feats_bf16, scale, shift, *, row_tile, k_tile,
                   apply_tanh=True):
    n_pad = adj_bf16.shape[0]
    dpad = feats_bf16.shape[1]
    # resident feats (double-buffered bf16) must fit the VMEM budget
    feats_resident = (2 * n_pad * dpad * 2) <= FEATS_RESIDENT_BYTES
    if feats_resident:
        feats_spec = pl.BlockSpec((n_pad, dpad), lambda i, k: (0, 0))
    else:  # fallback: stream feats per k tile (re-fetched per row tile)
        feats_spec = pl.BlockSpec((k_tile, dpad), lambda i, k: (k, 0))

    kern = functools.partial(_aggregate_kernel, k_tile=k_tile,
                             feats_resident=feats_resident,
                             apply_tanh=apply_tanh)
    return pl.pallas_call(
        kern,
        out_shape=jax.ShapeDtypeStruct((n_pad, dpad), jnp.bfloat16),
        grid_spec=pltpu.PrefetchScalarGridSpec(
            num_scalar_prefetch=0,
            grid=(n_pad // row_tile, n_pad // k_tile),
            in_specs=[pl.BlockSpec((row_tile, k_tile), lambda i, k: (i, k)),
                      feats_spec,
                      pl.BlockSpec((1, dpad), lambda i, k: (0, 0)),
                      pl.BlockSpec((1, dpad), lambda i, k: (0, 0))],
            out_specs=pl.BlockSpec((row_tile, dpad), lambda i, k: (i, 0)),
            scratch_shapes=[pltpu.VMEM((row_tile, dpad), jnp.float32)]),
        compiler_params=pltpu.CompilerParams(
            dimension_semantics=("parallel", "arbitrary"),
            vmem_limit_bytes=VMEM_LIMIT),
    )(adj_bf16, feats_bf16, scale, shift)


# -----------------------------------------------------------------------------
# Kernel 2a: ConvE features
#   bn0 -> conv1d(2->C,k,pad=k//2) (bn1+relu folded) -> flatten -> fc -> bn2+relu
# -----------------------------------------------------------------------------
def _conve_feat_kernel(e1_ref, rel_ref, s0_ref, sh0_ref, cw_ref, cb_ref,
                       fcwT_ref, fcb_ref, s2_ref, sh2_ref, o_ref, *, C, K, D):
    B = e1_ref.shape[0]
    pad = K // 2

    # bn0 (eval): per-channel affine on stacked [e1 ; rel] (channel dim of NCW)
    ch0 = e1_ref[...] * s0_ref[0] + sh0_ref[0]
    ch1 = rel_ref[...] * s0_ref[1] + sh0_ref[1]
    # inp_drop identity (eval)

    if pad > 0:
        z = jnp.zeros((B, pad), jnp.float32)
        chp = (jnp.concatenate([z, ch0, z], axis=-1),
               jnp.concatenate([z, ch1, z], axis=-1))
    else:
        chp = (ch0, ch1)

    # Hoist the 2*K shifted conv windows once; reuse across all C channels.
    wins = [[chp[ic][:, dk:dk + D] for dk in range(K)] for ic in range(2)]

    # TODO(synk): for production channel counts (C ~ 100-200, K=5) restructure
    # this unrolled tap loop as an im2col matmul; negligible at toy sizes.
    maps = []
    for c in range(C):                       # output channels (unrolled)
        acc = jnp.zeros((B, D), jnp.float32)
        for ic in range(2):                  # input channels
            for dk in range(K):              # kernel taps
                acc = acc + cw_ref[(c * 2 + ic) * K + dk] * wins[ic][dk]
        acc = acc + cb_ref[c]                # conv bias with bn1 folded in
        maps.append(jnp.maximum(acc, 0.0))   # relu ; feature_map_drop identity

    feat = jnp.concatenate(maps, axis=-1)    # (B, C*D) channel-major flatten
    h = jnp.dot(feat, fcwT_ref[...], preferred_element_type=jnp.float32)
    h = h + fcb_ref[...]
    # hidden_drop identity ; bn2 (eval) ; relu  (pad cols have scale=shift=0)
    o_ref[...] = jnp.maximum(h * s2_ref[...] + sh2_ref[...], 0.0)


def conve_features(e1_emb, rel_emb, p, *, dpad):
    B, D = e1_emb.shape
    conv_w = p['conv_w']
    C, _, K = conv_w.shape
    s0, sh0 = p['bn0']
    s1, sh1 = p['bn1']
    s2, sh2 = p['bn2']

    # Fold bn1 (eval affine) into conv weights / bias.
    w_fold = (conv_w * s1[:, None, None]).reshape(-1)
    b_fold = s1 * p['conv_b'] + sh1

    fcwT = _pad2(p['fc_w'].T, C * D, dpad)            # Linear: y = x @ W.T + b
    fcb = _pad1(p['fc_b'], dpad).reshape(1, dpad)
    s2p = _pad1(s2, dpad).reshape(1, dpad)            # pad cols zeroed -> h pad = 0
    sh2p = _pad1(sh2, dpad).reshape(1, dpad)

    b_pad = max(8, _round_up(B, 8))                   # fill f32 sublanes
    e1p = _pad2(e1_emb.astype(jnp.float32), b_pad, D)
    relp = _pad2(rel_emb.astype(jnp.float32), b_pad, D)

    kern = functools.partial(_conve_feat_kernel, C=C, K=K, D=D)
    return pl.pallas_call(
        kern,
        out_shape=jax.ShapeDtypeStruct((b_pad, dpad), jnp.float32),
        in_specs=[VMEM, VMEM, SMEM, SMEM, SMEM, SMEM, VMEM, VMEM, VMEM, VMEM],
        out_specs=VMEM,
        compiler_params=pltpu.CompilerParams(vmem_limit_bytes=VMEM_LIMIT),
    )(e1p, relp, s0, sh0, w_fold, b_fold, fcwT, fcb, s2p, sh2p)


# -----------------------------------------------------------------------------
# Kernel 2b: scoring  sigmoid(h @ e1_all^T), bf16 operands, tiled over entities
# -----------------------------------------------------------------------------
def _score_kernel(h_ref, eall_ref, o_ref):
    logits = jax.lax.dot_general(h_ref[...], eall_ref[...],
                                 (((1,), (1,)), ((), ())),
                                 preferred_element_type=jnp.float32)
    o_ref[...] = jax.nn.sigmoid(logits)


def conve_score(h_bf16, e1_all_bf16, *, n_tile):
    b_pad, dpad = h_bf16.shape
    n_pad = e1_all_bf16.shape[0]
    return pl.pallas_call(
        _score_kernel,
        out_shape=jax.ShapeDtypeStruct((b_pad, n_pad), jnp.float32),
        grid_spec=pltpu.PrefetchScalarGridSpec(
            num_scalar_prefetch=0,
            grid=(n_pad // n_tile,),
            in_specs=[pl.BlockSpec((b_pad, dpad), lambda j: (0, 0)),
                      pl.BlockSpec((n_tile, dpad), lambda j: (j, 0))],
            out_specs=pl.BlockSpec((b_pad, n_tile), lambda j: (0, j))),
        compiler_params=pltpu.CompilerParams(
            dimension_semantics=("parallel",),
            vmem_limit_bytes=VMEM_LIMIT),
    )(h_bf16, e1_all_bf16)


# -----------------------------------------------------------------------------
# Full forward pass (n_layer = 3, decoder = 'conve', eval mode)
# -----------------------------------------------------------------------------
def wgcn_base_forward(p, adj, entity_id, e1, rel):
    N = adj.shape[0]
    D = p['emb_rel'].shape[1]            # embedding_dim
    B = e1.shape[0]

    dims = (p['emb_e'].shape[1], p['gc1_w'].shape[1], p['gc2_w'].shape[1], D)
    dpad = _round_up(max(dims), 128)     # lane-dense feature width for all layers

    # ---- tiling -------------------------------------------------------------
    if N <= 2048:
        # small graphs: full row stripe per step; n_pad >= 256 so every
        # "parallel" grid axis gets >= 2 iterations (v7x megacore).
        n_pad = max(256, _round_up(N, 128))
        agg_k_tile = n_pad
    else:
        # large graphs: 1-2 MB bf16 adj tiles to amortize per-step overhead.
        n_pad = _round_up(N, 1024)
        agg_k_tile = 2048 if n_pad % 2048 == 0 else 1024
    agg_row_tile = _pick_tile(n_pad, (512, 256, 128))
    feats_row_tile = _pick_tile(n_pad, (2048, 1024, 512, 256, 128))
    score_tile = _pick_tile(n_pad, (2048, 1024, 512, 256, 128))

    adj_p = _pad2(adj, n_pad, n_pad).astype(jnp.bfloat16)   # cast once (dominant traffic)
    x = _pad2(p['emb_e'][entity_id], n_pad, dpad).astype(jnp.bfloat16)  # gather (glue)

    def layer(x_bf, w, b, bn, apply_bn=True, apply_tanh=True):
        w_p = _pad2(w, dpad, dpad).astype(jnp.bfloat16)
        feats = wgcn_feats(x_bf, w_p, row_tile=feats_row_tile)
        if apply_bn:
            sc, sh = bn
            scale_d = sc
            shift_d = b * sc + sh            # fold GC bias into BN(eval) shift
        else:
            scale_d = jnp.ones_like(b)
            shift_d = b
        scale = _pad1(scale_d, dpad).reshape(1, dpad)   # pad cols stay 0
        shift = _pad1(shift_d, dpad).reshape(1, dpad)
        return wgcn_aggregate(adj_p, feats, scale, shift,
                              row_tile=agg_row_tile, k_tile=agg_k_tile,
                              apply_tanh=apply_tanh)

    x = layer(x, p['gc1_w'], p['gc1_b'], p['bn5'])   # gc1 + bn5 + tanh (+drop id)
    x = layer(x, p['gc2_w'], p['gc2_b'], p['bn3'])   # gc2 + bn3 + tanh (+drop id)
    x = layer(x, p['gc3_w'], p['gc3_b'], p['bn4'])   # gc3 + final_bn + final_act
    e1_all_bf = x                                    # (n_pad, dpad) bf16, pad cols == 0

    e1_emb = e1_all_bf[e1][:, :D].astype(jnp.float32)   # [B, emb_dim] gather (glue)
    rel_emb = p['emb_rel'][rel]                          # [B, emb_dim]

    h = conve_features(e1_emb, rel_emb, p, dpad=dpad)    # (B_pad, dpad) f32
    h_bf = h.astype(jnp.bfloat16)                        # bf16 operands for scoring MXU
    pred_pad = conve_score(h_bf, e1_all_bf, n_tile=score_tile)
    return pred_pad[:B, :N]


# -----------------------------------------------------------------------------
# Deterministic parameter / graph construction (synthetic, no checkpoint)
# -----------------------------------------------------------------------------
def xavier_normal(key, shape, gain=1.0):
    fan_out, fan_in = shape[0], shape[1]
    std = gain * math.sqrt(2.0 / (fan_in + fan_out))
    return std * jax.random.normal(key, shape, dtype=jnp.float32)


def uniform_init(key, shape, bound):
    return jax.random.uniform(key, shape, jnp.float32, -bound, bound)


def bn_eval_affine(num_features, eps=1e-5):
    gamma = jnp.ones((num_features,), jnp.float32)
    beta = jnp.zeros((num_features,), jnp.float32)
    mean = jnp.zeros((num_features,), jnp.float32)
    var = jnp.ones((num_features,), jnp.float32)
    scale = gamma / jnp.sqrt(var + eps)
    shift = beta - mean * scale
    return scale, shift


if __name__ == "__main__":
    # Small config consistent with the module's __init__ / forward
    N_ENT, N_REL = 32, 4
    INIT_EMB, GC1_EMB, EMB_DIM = 16, 24, 32
    CHANNELS, KSIZE = 4, 3
    B = 2
    E_TRAIN = 40

    key = jax.random.PRNGKey(0)
    ks = jax.random.split(key, 16)

    def gc_params(k, din, dout):
        k1, k2 = jax.random.split(k)
        stdv = 1.0 / math.sqrt(dout)
        return uniform_init(k1, (din, dout), stdv), uniform_init(k2, (dout,), stdv)

    params = {
        'emb_e': xavier_normal(ks[0], (N_ENT, INIT_EMB), gain=math.sqrt(2.0)),
        'emb_rel': xavier_normal(ks[1], (N_REL, EMB_DIM), gain=math.sqrt(2.0)),
        'conv_w': uniform_init(ks[6], (CHANNELS, 2, KSIZE), 1.0 / math.sqrt(2 * KSIZE)),
        'conv_b': uniform_init(ks[7], (CHANNELS,), 1.0 / math.sqrt(2 * KSIZE)),
        'fc_w': uniform_init(ks[8], (EMB_DIM, EMB_DIM * CHANNELS),
                             1.0 / math.sqrt(EMB_DIM * CHANNELS)),
        'fc_b': uniform_init(ks[9], (EMB_DIM,), 1.0 / math.sqrt(EMB_DIM * CHANNELS)),
        'bn0': bn_eval_affine(2),
        'bn1': bn_eval_affine(CHANNELS),
        'bn2': bn_eval_affine(EMB_DIM),
        'bn3': bn_eval_affine(GC1_EMB),
        'bn4': bn_eval_affine(EMB_DIM),
        'bn5': bn_eval_affine(GC1_EMB),
    }
    params['gc1_w'], params['gc1_b'] = gc_params(ks[2], INIT_EMB, GC1_EMB)
    params['gc2_w'], params['gc2_b'] = gc_params(ks[3], GC1_EMB, GC1_EMB)
    params['gc3_w'], params['gc3_b'] = gc_params(ks[4], GC1_EMB, EMB_DIM)

    # alpha edge-weight embedding: Embedding(num_relations + 1, 1, padding_idx=0)
    alpha_tbl = jax.random.normal(ks[5], (N_REL + 1, 1), jnp.float32).at[0].set(0.0)

    # Synthetic graph: E_TRAIN forward edges + their reverses + self loops
    src = jax.random.randint(ks[10], (E_TRAIN,), 0, N_ENT)
    dst = jax.random.randint(ks[11], (E_TRAIN,), 0, N_ENT)
    fwd_t = jax.random.randint(ks[12], (E_TRAIN,), 1, N_REL + 1)
    rev_t = jax.random.randint(ks[13], (E_TRAIN,), 1, N_REL + 1)
    self_t = jnp.full((N_ENT,), N_REL, dtype=jnp.int32)

    all_edge_type = jnp.concatenate([fwd_t, rev_t, self_t])
    # wsi=False branch of GraphConvolution.forward
    E = E_TRAIN
    transpose_all_edge_type = jnp.concatenate(
        [all_edge_type[E:2 * E], all_edge_type[:E], all_edge_type[-N_ENT:]])
    alp = alpha_tbl[all_edge_type, 0] + alpha_tbl[transpose_all_edge_type, 0]

    loops = jnp.arange(N_ENT, dtype=src.dtype)
    srcs = jnp.concatenate([src, dst, loops])
    dsts = jnp.concatenate([dst, src, loops])
    adj = jnp.zeros((N_ENT, N_ENT), jnp.float32).at[dsts, srcs].add(alp)

    entity_id = jnp.arange(N_ENT, dtype=jnp.int32)
    e1 = jnp.array([3, 17], dtype=jnp.int32)
    rel = jnp.array([1, 2], dtype=jnp.int32)

    pred = wgcn_base_forward(params, adj, entity_id, e1, rel)
    pred = jax.block_until_ready(pred)

    assert pred.shape == (B, N_ENT), pred.shape
    assert bool(jnp.all(jnp.isfinite(pred)))
    assert bool(jnp.all((pred >= 0.0) & (pred <= 1.0)))
    print("KERNEL_OK")
</pallas_src>

<mosaic_0001>
module attributes {stable_mosaic.version = 11 : i64} {
  func.func @_feats_kernel(%arg0: i32, %arg1: memref<128x128xbf16, #tpu.memory_space<vmem>>, %arg2: memref<128x128xbf16, #tpu.memory_space<vmem>>, %arg3: memref<128x128xbf16, #tpu.memory_space<vmem>>) attributes {dimension_semantics = [#tpu.dimension_semantics<parallel>], iteration_bounds = array<i64: 2>, scalar_prefetch = 0 : i64, scratch_operands = 0 : i64, tpu.core_type = #tpu.core_type<tc>, window_params = [{transform_indices = @transform_0, window_bounds = array<i64: 128, 128>}, {pipeline_mode = #tpu.pipeline_mode<synchronous>, transform_indices = @transform_1, window_bounds = array<i64: 128, 128>}, {transform_indices = @transform_2, window_bounds = array<i64: 128, 128>}]} {
    %c0 = arith.constant 0 : index
    %c0_0 = arith.constant 0 : index
    %0 = vector.load %arg1[%c0, %c0_0] : memref<128x128xbf16, #tpu.memory_space<vmem>>, vector<128x128xbf16>
    %c0_1 = arith.constant 0 : index
    %c0_2 = arith.constant 0 : index
    %1 = vector.load %arg2[%c0_1, %c0_2] : memref<128x128xbf16, #tpu.memory_space<vmem>>, vector<128x128xbf16>
    %cst = arith.constant dense<0.000000e+00> : vector<128x128xf32>
    %2 = tpu.matmul %0, %1, %cst {dimension_numbers = #tpu.dot_dimension_numbers<[1], [0], [0], [1], [0, 0, 1, 1], [], []>} : vector<128x128xbf16>, vector<128x128xbf16>, vector<128x128xf32> -> vector<128x128xf32>
    %3 = arith.truncf %2 : vector<128x128xf32> to vector<128x128xbf16>
    %c0_3 = arith.constant 0 : index
    %c0_4 = arith.constant 0 : index
    %4 = vector.load %arg3[%c0_3, %c0_4] : memref<128x128xbf16, #tpu.memory_space<vmem>>, vector<128x128xbf16>
    tpu.vector_store %arg3[%c0_3, %c0_4], %3 {strides = array<i32>} : memref<128x128xbf16, #tpu.memory_space<vmem>>, vector<128x128xbf16>,
    return
  }
  func.func @transform_0(%arg0: i32) -> (i32, i32) {
    %c0_i32 = arith.constant 0 : i32
    %c0_i32_0 = arith.constant 0 : i32
    return %arg0, %c0_i32 : i32, i32
  }
  func.func @transform_1(%arg0: i32) -> (i32, i32) {
    %c0_i32 = arith.constant 0 : i32
    %c0_i32_0 = arith.constant 0 : i32
    %c0_i32_1 = arith.constant 0 : i32
    return %c0_i32, %c0_i32_0 : i32, i32
  }
  func.func @transform_2(%arg0: i32) -> (i32, i32) {
    %c0_i32 = arith.constant 0 : i32
    %c0_i32_0 = arith.constant 0 : i32
    return %arg0, %c0_i32 : i32, i32
  }
}

</mosaic_0001>

<bundles_post_ra>
// kernel: tpu_custom_call.1
= control target key start
LH: loop header
LB: loop body
LE: loop exit
PB: predicated region body
PF: predicated region fallthrough
CT: control target
= control target key end

     0   :  { %7 = vsyncpa [#allocation3], 0  ;;  %s1031_s0 = inlined_call_operand.hbm [shape: bf16[256,128], index: 0, kind: input, shape index: {}]   ;;  %s1032_s1 = inlined_call_operand.hbm [shape: bf16[128,128], index: 1, kind: input, shape index: {}]   ;;  %s1033_s2 = inlined_call_operand.hbm [shape: bf16[256,128], index: 2, kind: output, shape index: {}]  }
   0x1   :  { %9 = vsyncpa [#allocation3 + $0x1], 0 }
   0x2   :  { %10 = vsyncpa [#allocation6], 0 }
   0x3   :  { %11 = vsyncpa [#allocation4], 0 }
   0x4   :  { %13 = vsyncpa [#allocation4 + $0x1], 0  ;;  %s873_s9 = smov 0   ;;  %s875_s10 = smov 0  }
   0x5   :  { %s877_s11 = smov 0   ;;  %s879_s12 = smov 0  }
   0x6 LB: > { %s894_s13 = sadd.s32 4294967295, %s851_s12   ;;  %s491_s14 = sadd.s32 4294967294, %s851_s12   ;;  %s851_s12 = sphi %s879_s12, %s1043_s12   ;;  %s847_s11 = sphi %s877_s11, %s1042_s11   ;;  %s843_s10 = sphi %s875_s10, %s1041_s10   ;;  %s839_s9 = sphi %s873_s9, %s1040_s9  }
   0x7   : > { %p39_p0 = scmp.ne.s32.totalorder %s843_s10, %s839_s9  ;;  %p40_p1 = scmp.eq.s32.totalorder %s894_s13, 0 }
   0x8   : > { %p84_p2 = scmp.eq.s32.totalorder %s894_s13, 1  ;;  %p90_p3 = scmp.eq.s32.totalorder %s491_s14, 1 }
   0x9   : > { %p903_p4 = por %p40_p1, %p39_p0  ;;  %p492_p5 = scmp.ge.s32.totalorder %s851_s12, 1 }
   0xa   : > { %p908_p6 = por %p90_p3, %p39_p0  ;;  %p97_p7 = scmp.lt.s32.totalorder %s851_s12, 3 }
   0xb   : > { %s108_s19 = sshll.u32 %s1032_s1, 4  ;;  %s853_s21 = smov [#allocation5]   ;;  %s109_s19 = int_to_ptr.hbm [resolvable:$true] %s108_s19 }
   0xc   : > { %p916_p8 = pnand %p492_p5, %p97_p7  ;;  %s110_s22 = sshll.u32 %s853_s21, 4  ;;  %s111_s22 = int_to_ptr.vmem [resolvable:$true] %s110_s22 }
   0xd   : > { %s926_s23 = sadd.s32 1, %s851_s12   ;;  %s854_s24 = smov 64  }
   0xe   : > { %p668_p9 = pneg %p916_p8  ;;  %s855_s25 = smov 4  }
   0xf   : > { %s23_s26 = ssub.s32 %s851_s12, %s926_s23  ;;  %s26_s27 = sadd.s32 1, %s847_s11 }
  0x10   : > { %p669_p10 = pnand %p668_p9, %p40_p1  ;;  %p24_p12 = scmp.eq.s32.totalorder %s23_s26, 0 }
  0x11   : > { %p33_p13 = scmp.ne.s32.totalorder %s847_s11, %s843_s10  ;;  %p34_p0 = scmp.eq.s32.totalorder %s851_s12, 0 }
  0x12   : > { %671 = dma.hbm_to_vmem [thread:$0]  (!%p669_p10), %s109_s19, 1024, %s111_s22, [#allocation6], %s854_s24, %s854_s24, %s855_s25  }
  0x13   : > { %s938_s28 = scalar_select %p24_p12, %s847_s11, %s26_s27  }
  0x14   : > { %p942_p3 = por %p84_p2, %p33_p13  ;;  %p681_p5 = scmp.lt.s32.totalorder %s851_s12, 2 }
  0x15   : > { %s124_s30 = sand.u32 1, %s847_s11   ;;  %s571_s3 = sshll.u32 %s851_s12, 6 }
  0x16   : > { %p35_p7 = por %p34_p0, %p33_p13  ;;  %s495_s4 = sshll.u32 %s124_s30, 6 }
  0x17   : > { %s133_s7 = scalar_lea.hbm %s1031_s0, %s571_s3  ;;  %s128_s14 = scalar_lea.vmem [#allocation2], %s495_s4 }
  0x18   : > { %s134_s8 = sshll.u32 %s133_s7, 4  ;;  %s136_s17 = sshll.u32 %s128_s14, 4  ;;  %s135_s8 = int_to_ptr.hbm [resolvable:$true] %s134_s8  ;;  %s137_s17 = int_to_ptr.vmem [resolvable:$true] %s136_s17 }
  0x19   : > { %p952_p9 = pnand %p681_p5, %p35_p7  ;;  %s125_s19 = scalar_lea.sflag [#allocation3], %s124_s30 }
  0x1a   : > { %s751_s21 = sshra.s32 %s135_s8, 4  ;;  %s758_s3 = scalar_lea.hbm %s1031_s0, 128  ;;  %s752_s21 = int_to_ptr.hbm [resolvable:$true] %s751_s21 }
  0x1b   : > { %s753_s22 = scalar_lea.hbm %s752_s21, 64  ;;  %p755_p10 = pneg %p952_p9 }
  0x1c   : > { %p754_p2 = scmp.ne.s32.totalorder %s752_s21, %s753_s22  ;;  %p759_p0 = scmp.lt.s32.totalorder %s752_s21, %s1031_s0 }
  0x1d   : > { %p760_p5 = scmp.lt.s32.totalorder %s758_s3, %s753_s22 }
  0x1e   : > { %p756_p12 = pnand %p755_p10, %p754_p2 }
  0x1f   : > { %p761_p7 = por %p760_p5, %p759_p0 }
  0x20   : > { %p757_p13 = pneg %p756_p12 }
  0x22   : > { %p762_p11 = pnand %p761_p7, %p757_p13 }
  0x24   : > { %765 = shalt.err (!%p762_p11)
}
  0x25   : > { %675 = dma.hbm_to_vmem [thread:$0]  (!%p952_p9), %s135_s8, 1024, %s137_s17, %s125_s19, %s854_s24, %s854_s24, %s855_s25  }
  0x26   : > { %148 = sbr.rel (%p916_p8) target bundleno = 242 (0xf2), region = 28  ;;  %s972_s30 = sand.u32 (!%p916_p8), 1, %s843_s10  }
  0x27   : > { %s499_s6 = sshll.u32 (!%p916_p8), %s972_s30, 6  ;;  %s151_s7 = scalar_lea.sflag (!%p916_p8), [#allocation3], %s972_s30 }
  0x28   : > { %s978_s14 = scalar_lea.vmem (!%p916_p8), [#allocation2], %s499_s6 }
  0x2b   : > { %826 = dma.done.wait (%p903_p4), %s151_s7, 1024  }
  0x2c   : > { %828 = vsyncadd (%p903_p4), %s151_s7, 4294966272 }
  0x2d   : > { %830 = dma.done.wait (%p40_p1), [#allocation6], 1024  }
  0x2e   : > { %832 = vsyncadd (%p40_p1), [#allocation6], 4294966272  ;;  %v587_v0 = vld [vmem:[#allocation5 + $0x38] sm:$0xff]  ;;  %v586_v1 = vld [vmem:[#allocation5 + $0x30] sm:$0xff]  ;;  %s180_s15 = scalar_lea.vmem [#allocation7], %s499_s6  ;;  %s588_s20 = sshll.u32 %s894_s13, 6 }
  0x2f   : > { %311 = vmatpush.bf16.msra.mxu0 %v587_v0  ;;  %636 = vmatpush.bf16.msra.mxu1 %v587_v0  ;;  %v585_v2 = vld [vmem:[#allocation5 + $0x28] sm:$0xff]  ;;  %v584_v3 = vld [vmem:[#allocation5 + $0x20] sm:$0xff]  ;;  %v583_v4 = vld [vmem:[#allocation5 + $0x18] sm:$0xff]  ;;  %s404_s8 = scalar_lea.hbm %s1033_s2, %s588_s20  ;;  %s405_s17 = sshll.u32 %s180_s15, 4  ;;  %s406_s17 = int_to_ptr.vmem [resolvable:$true] %s405_s17 }
  0x30   : > { %637 = vmatpush.bf16.msra.mxu2 %v587_v0  ;;  %638 = vmatpush.bf16.msra.mxu3 %v587_v0  ;;  %v582_v5 = vld [vmem:[#allocation5 + $0x10] sm:$0xff]  ;;  %v581_v6 = vld [vmem:[#allocation5 + $0x8] sm:$0xff]  ;;  %v580_v7 = vld [vmem:[#allocation5] sm:$0xff]  ;;  %s407_s18 = sshll.u32 %s404_s8, 4  ;;  %s393_s13 = scalar_lea.sflag [#allocation4], %s972_s30  ;;  %s408_s18 = int_to_ptr.hbm [resolvable:$true] %s407_s18 }
  0x31   : > { %v572_v8 = vld [vmem:[%s978_s14] sm:$0xff]  ;;  %v574_v9 = vld [vmem:[%s978_s14 + $0x10] sm:$0xff]  ;;  %v573_v12 = vld [vmem:[%s978_s14 + $0x8] sm:$0xff]  ;;  %s795_s19 = sshra.s32 %s408_s18, 4  ;;  %s801_s27 = scalar_lea.hbm %s1033_s2, 128  ;;  %s796_s19 = int_to_ptr.hbm [resolvable:$true] %s795_s19 }
  0x32   : > { %v576_v10 = vld [vmem:[%s978_s14 + $0x20] sm:$0xff]  ;;  %v578_v11 = vld [vmem:[%s978_s14 + $0x30] sm:$0xff]  ;;  %v575_v13 = vld [vmem:[%s978_s14 + $0x18] sm:$0xff]  ;;  %s797_s21 = scalar_lea.hbm %s796_s19, 64  ;;  %p802_p11 = scmp.lt.s32.totalorder %s796_s19, %s1033_s2 }
  0x33   : > { %312 = vmatpush.bf16.msra.mxu0 %v586_v1  ;;  %639 = vmatpush.bf16.msra.mxu1 %v586_v1  ;;  %v577_v14 = vld [vmem:[%s978_s14 + $0x28] sm:$0xff]  ;;  %v579_v15 = vld [vmem:[%s978_s14 + $0x38] sm:$0xff]  ;;  %p798_p1 = scmp.ne.s32.totalorder %s796_s19, %s797_s21  ;;  %p803_p9 = scmp.lt.s32.totalorder %s801_s27, %s797_s21 }
  0x34   : > { %640 = vmatpush.bf16.msra.mxu2 %v586_v1  ;;  %641 = vmatpush.bf16.msra.mxu3 %v586_v1 }
  0x35   : > { %p799_p4 = pnand %p798_p1, %p942_p3  ;;  %p804_p2 = por %p803_p9, %p802_p11 }
  0x37   : > { %313 = vmatpush.bf16.msra.mxu0 %v585_v2  ;;  %642 = vmatpush.bf16.msra.mxu1 %v585_v2  ;;  %p800_p8 = pneg %p799_p4 }
  0x38   : > { %643 = vmatpush.bf16.msra.mxu2 %v585_v2  ;;  %644 = vmatpush.bf16.msra.mxu3 %v585_v2 }
  0x39   : > { %p805_p10 = pnand %p804_p2, %p800_p8 }
  0x3b   : > { %314 = vmatpush.bf16.msra.mxu0 %v584_v3  ;;  %645 = vmatpush.bf16.msra.mxu1 %v584_v3 }
  0x3c   : > { %646 = vmatpush.bf16.msra.mxu2 %v584_v3  ;;  %647 = vmatpush.bf16.msra.mxu3 %v584_v3 }
  0x3f   : > { %315 = vmatpush.bf16.msra.mxu0 %v583_v4  ;;  %648 = vmatpush.bf16.msra.mxu1 %v583_v4 }
  0x40   : > { %649 = vmatpush.bf16.msra.mxu2 %v583_v4  ;;  %650 = vmatpush.bf16.msra.mxu3 %v583_v4 }
  0x43   : > { %316 = vmatpush.bf16.msra.mxu0 %v582_v5  ;;  %651 = vmatpush.bf16.msra.mxu1 %v582_v5 }
  0x44   : > { %652 = vmatpush.bf16.msra.mxu2 %v582_v5  ;;  %653 = vmatpush.bf16.msra.mxu3 %v582_v5 }
  0x47   : > { %317 = vmatpush.bf16.msra.mxu0 %v581_v6  ;;  %654 = vmatpush.bf16.msra.mxu1 %v581_v6 }
  0x48   : > { %655 = vmatpush.bf16.msra.mxu2 %v581_v6  ;;  %656 = vmatpush.bf16.msra.mxu3 %v581_v6 }
  0x4b   : > { %318 = vmatpush.bf16.msra.mxu0 %v580_v7  ;;  %657 = vmatpush.bf16.msra.mxu1 %v580_v7 }
  0x4c   : > { %658 = vmatpush.bf16.msra.mxu2 %v580_v7  ;;  %659 = vmatpush.bf16.msra.mxu3 %v580_v7 }
  0x4e   : > { %319 = vmatmul.bf16.vlgmr.msra.gmra.mxu0 %v572_v8  ;;  %329 = vmatmul.bf16.vlgmr.msra.gmra.mxu1 %v574_v9 }
  0x4f   : > { %339 = vmatmul.bf16.vlgmr.msra.gmra.mxu2 %v576_v10  ;;  %349 = vmatmul.bf16.vlgmr.msra.gmra.mxu3 %v578_v11 }
  0x5e   : > { %324 = vmatmul.bf16.gmra.mxu0 %v573_v12  ;;  %334 = vmatmul.bf16.gmra.mxu1 %v575_v13 }
  0x5f   : > { %344 = vmatmul.bf16.gmra.mxu2 %v577_v14  ;;  %354 = vmatmul.bf16.gmra.mxu3 %v579_v15 }
  0xcb   : > { %v320_v16 = vpop.f32.mrf.mxu0  ;;  %v330_v17 = vpop.f32.mrf.mxu1 }
  0xd2   : > { %v340_v18 = vpop.f32.mrf.mxu2  ;;  %v350_v19 = vpop.f32.mrf.mxu3 }
  0xd3   : > { %v322_v20 = vpop.f32.mrf.mxu0  ;;  %v332_v21 = vpop.f32.mrf.mxu1 }
  0xd4   : > { %v592_v22 = vpack.c.bf16 %v322_v20, %v320_v16  ;;  %v602_v23 = vpack.c.bf16 %v332_v21, %v330_v17 }
  0xd6   : > { %593 = vst [vmem:[%s180_s15] sm:$0xff] %v592_v22  }
  0xd7   : > { %630 = vst [vmem:[%s180_s15 + $0x10] sm:$0xff] %v602_v23  }
  0xda   : > { %v342_v24 = vpop.f32.mrf.mxu2  ;;  %v352_v25 = vpop.f32.mrf.mxu3 }
  0xdb   : > { %v612_v26 = vpack.c.bf16 %v342_v24, %v340_v18  ;;  %v622_v27 = vpack.c.bf16 %v352_v25, %v350_v19  ;;  %v325_v28 = vpop.f32.mrf.mxu0  ;;  %v335_v29 = vpop.f32.mrf.mxu1 }
  0xdd   : > { %632 = vst [vmem:[%s180_s15 + $0x20] sm:$0xff] %v612_v26  }
  0xde   : > { %634 = vst [vmem:[%s180_s15 + $0x30] sm:$0xff] %v622_v27  }
  0xe2   : > { %v345_v30 = vpop.f32.mrf.mxu2  ;;  %v355_v31 = vpop.f32.mrf.mxu3 }
  0xe3   : > { %v327_v32 = vpop.f32.mrf.mxu0  ;;  %v337_v33 = vpop.f32.mrf.mxu1 }
  0xe4   : > { %v597_v34 = vpack.c.bf16 %v327_v32, %v325_v28  ;;  %v607_v35 = vpack.c.bf16 %v337_v33, %v335_v29 }
  0xe6   : > { %629 = vst [vmem:[%s180_s15 + $0x8] sm:$0xff] %v597_v34  }
  0xe7   : > { %631 = vst [vmem:[%s180_s15 + $0x18] sm:$0xff] %v607_v35  }
  0xea   : > { %v347_v36 = vpop.f32.mrf.mxu2  ;;  %v357_v37 = vpop.f32.mrf.mxu3 }
  0xeb   : > { %v617_v38 = vpack.c.bf16 %v347_v36, %v345_v30  ;;  %v627_v39 = vpack.c.bf16 %v357_v37, %v355_v31 }
  0xed   : > { %633 = vst [vmem:[%s180_s15 + $0x28] sm:$0xff] %v617_v38  }
  0xee   : > { %635 = vst [vmem:[%s180_s15 + $0x38] sm:$0xff] %v627_v39  }
  0xef   : > { %808 = shalt.err (!%p805_p10)
}
  0xf0   : > { %s856_s5 = smov 64   ;;  %s857_s30 = smov 4  }
  0xf1   : > { %666 = dma.vmem_to_hbm [thread:$0]  (%p942_p3), %s406_s17, 1024, %s408_s18, %s393_s13, %s856_s5, %s856_s5, %s857_s30  }
  0xf2 PF: > { %s422_s6 = sand.u32 1, %s839_s9   ;;  %p1039_p12 = scmp.ge.s32.totalorder %s851_s12, 2 }
  0xf3   : > { %s423_s7 = scalar_lea.sflag [#allocation4], %s422_s6 }
  0xf4   : > { %p677_p13 = pnand %p1039_p12, %p908_p6 }
  0xf6   : > { %p678_p0 = pneg %p677_p13 }
  0xf8   : > { %834 = dma.done.wait (%p678_p0), %s423_s7, 1024  }
  0xf9   : > { %836 = vsyncadd (%p678_p0), %s423_s7, 4294966272  ;;  %p16_p5 = scmp.ge.s32.totalorder %s926_s23, 4   ;;  %s1040_s9 = smov %s843_s10 }
  0xfa   : > { %s1041_s10 = smov %s847_s11  ;;  %s1042_s11 = smov %s938_s28 }
  0xfb   : > { %s1043_s12 = smov %s926_s23  ;;  %18 = sbr.rel (!%p16_p5) target bundleno = 6 (0x6), region = 77 }
 0x100   :  { %429 = vsyncpa [#allocation3], 1 }
 0x101   :  { %431 = vsyncpa [#allocation3 + $0x1], 1 }
 0x102   :  { %432 = vsyncpa [#allocation6], 1 }
 0x103   :  { %433 = vsyncpa [#allocation4], 1 }
 0x104   :  { %435 = vsyncpa [#allocation4 + $0x1], 1 }

</bundles_post_ra>
